<compile_context>
chip_gen: v5e
topology: v5e:2x2
jax: 0.10.0
libtpu: 0.0.40
codegen_flags: <defaults>
</compile_context>

<pallas_src>
import jax
import jax.numpy as jnp
from jax.experimental import pallas as pl
from jax.experimental.pallas import tpu as pltpu

_LANE = 128
_SUBLANE = 8
_TARGET_BLOCK_BYTES = 4 * 1024 * 1024  # ~4 MiB per input block


def _imagenet_norm_kernel(a_ref, b_ref, x_ref, o_ref):
    # Folded affine: ((x + 1)/2 - mean)/std == x * a + b
    o_ref[...] = x_ref[...] * a_ref[...] + b_ref[...]


def _pick_row_tile(P, elem_bytes):
    """Largest divisor of P that is a multiple of 8 and keeps a single
    (bs, 128) slab under the block-size target. Full P if P % 8 != 0
    (a full-extent trailing dim is always a legal block)."""
    if P % _SUBLANE != 0:
        return P
    cap_rows = max(_SUBLANE, _TARGET_BLOCK_BYTES // (_LANE * elem_bytes))
    best = _SUBLANE
    d = _SUBLANE
    while d <= P:
        if P % d == 0 and d <= cap_rows:
            best = d
        d += _SUBLANE
    return best


def _pick_nc_tile(NC, row_block_bytes):
    """Largest divisor of N*C keeping the whole block under the target."""
    cap = max(1, _TARGET_BLOCK_BYTES // row_block_bytes)
    best = 1
    for d in range(1, NC + 1):
        if NC % d == 0 and d <= cap:
            best = d
    return best


def imagenet_normalize(x, mean, std):
    """x: (N, C, H, W) float32 in [-1, 1]; mean/std: (C,) float32."""
    N, C, H, W = x.shape
    NC = N * C
    HW = H * W

    # Fold the whole op into one per-channel scale/bias (removes the divide).
    a = (0.5 / std).astype(x.dtype)            # (C,)
    b = ((0.5 - mean) / std).astype(x.dtype)   # (C,)
    a_rows = jnp.tile(a, N).reshape(NC, 1, 1)  # row n*C + c  ->  channel c
    b_rows = jnp.tile(b, N).reshape(NC, 1, 1)

    # Lane-dense view: (N*C, P, 128). Pad flattened spatial axis if needed.
    pad = (-HW) % _LANE
    x_flat = x.reshape(NC, HW)
    if pad:
        x_flat = jnp.pad(x_flat, ((0, 0), (0, pad)))
    P = (HW + pad) // _LANE
    x_lanes = x_flat.reshape(NC, P, _LANE)

    elem_bytes = x.dtype.itemsize
    bs = _pick_row_tile(P, elem_bytes)
    bnc = _pick_nc_tile(NC, bs * _LANE * elem_bytes)
    grid = (NC // bnc, P // bs)

    out = pl.pallas_call(
        _imagenet_norm_kernel,
        out_shape=jax.ShapeDtypeStruct((NC, P, _LANE), x.dtype),
        grid_spec=pltpu.PrefetchScalarGridSpec(
            num_scalar_prefetch=0,
            grid=grid,
            in_specs=[
                pl.BlockSpec((bnc, 1, 1), lambda i, j: (i, 0, 0)),       # a
                pl.BlockSpec((bnc, 1, 1), lambda i, j: (i, 0, 0)),       # b
                pl.BlockSpec((bnc, bs, _LANE), lambda i, j: (i, j, 0)),  # x
            ],
            out_specs=pl.BlockSpec((bnc, bs, _LANE), lambda i, j: (i, j, 0)),
        ),
        compiler_params=pltpu.CompilerParams(
            # Elementwise: every block is independent -> both axes parallel.
            dimension_semantics=("parallel", "parallel"),
            vmem_limit_bytes=48 * 1024 * 1024,
        ),
    )(a_rows, b_rows, x_lanes)

    out = out.reshape(NC, P * _LANE)
    if pad:
        out = out[:, :HW]
    return out.reshape(N, C, H, W)


if __name__ == "__main__":
    key = jax.random.PRNGKey(0)
    N, C, H, W = 2, 3, 16, 16  # module has fixed C=3 (ImageNet mean/std)
    # Inputs in [-1, 1], as the module expects.
    x = jax.random.uniform(key, (N, C, H, W), jnp.float32, minval=-1.0, maxval=1.0)

    # Deterministic "buffers" from the module __init__.
    mean = jnp.array([0.485, 0.456, 0.406], dtype=jnp.float32)
    std = jnp.array([0.229, 0.224, 0.225], dtype=jnp.float32)

    out = imagenet_normalize(x, mean, std)
    out = jax.block_until_ready(out)

    # Reference check in plain JAX (folded form differs by a few ULP).
    ref = ((x + 1.0) * 0.5 - mean.reshape(1, C, 1, 1)) / std.reshape(1, C, 1, 1)
    assert jnp.allclose(out, ref, atol=1e-5, rtol=1e-5), "mismatch vs reference"

    print("KERNEL_OK")
</pallas_src>

<mosaic_0001>
module attributes {stable_mosaic.version = 11 : i64} {
  func.func @_imagenet_norm_kernel(%arg0: i32, %arg1: i32, %arg2: memref<6x1x1xf32, #tpu.memory_space<vmem>>, %arg3: memref<6x1x1xf32, #tpu.memory_space<vmem>>, %arg4: memref<6x2x128xf32, #tpu.memory_space<vmem>>, %arg5: memref<6x2x128xf32, #tpu.memory_space<vmem>>) attributes {dimension_semantics = [#tpu.dimension_semantics<parallel>, #tpu.dimension_semantics<parallel>], iteration_bounds = array<i64: 1, 1>, scalar_prefetch = 0 : i64, scratch_operands = 0 : i64, tpu.core_type = #tpu.core_type<tc>, window_params = [{transform_indices = @transform_0, window_bounds = array<i64: 6, 1, 1>}, {transform_indices = @transform_1, window_bounds = array<i64: 6, 1, 1>}, {transform_indices = @transform_2, window_bounds = array<i64: 6, 2, 128>}, {transform_indices = @transform_3, window_bounds = array<i64: 6, 2, 128>}]} {
    %c0 = arith.constant 0 : index
    %c0_0 = arith.constant 0 : index
    %c0_1 = arith.constant 0 : index
    %0 = vector.load %arg4[%c0, %c0_0, %c0_1] : memref<6x2x128xf32, #tpu.memory_space<vmem>>, vector<6x2x128xf32>
    %c0_2 = arith.constant 0 : index
    %c0_3 = arith.constant 0 : index
    %c0_4 = arith.constant 0 : index
    %1 = vector.load %arg2[%c0_2, %c0_3, %c0_4] : memref<6x1x1xf32, #tpu.memory_space<vmem>>, vector<6x1x1xf32>
    %2 = vector.broadcast %1 : vector<6x1x1xf32> to vector<6x2x128xf32>
    %3 = arith.mulf %0, %2 : vector<6x2x128xf32>
    %c0_5 = arith.constant 0 : index
    %c0_6 = arith.constant 0 : index
    %c0_7 = arith.constant 0 : index
    %4 = vector.load %arg3[%c0_5, %c0_6, %c0_7] : memref<6x1x1xf32, #tpu.memory_space<vmem>>, vector<6x1x1xf32>
    %5 = vector.broadcast %4 : vector<6x1x1xf32> to vector<6x2x128xf32>
    %6 = arith.addf %3, %5 : vector<6x2x128xf32>
    %c0_8 = arith.constant 0 : index
    %c0_9 = arith.constant 0 : index
    %c0_10 = arith.constant 0 : index
    %7 = vector.load %arg5[%c0_8, %c0_9, %c0_10] : memref<6x2x128xf32, #tpu.memory_space<vmem>>, vector<6x2x128xf32>
    tpu.vector_store %arg5[%c0_8, %c0_9, %c0_10], %6 {strides = array<i32>} : memref<6x2x128xf32, #tpu.memory_space<vmem>>, vector<6x2x128xf32>,
    return
  }
  func.func @transform_0(%arg0: i32, %arg1: i32) -> (i32, i32, i32) {
    %c0_i32 = arith.constant 0 : i32
    %c0_i32_0 = arith.constant 0 : i32
    %c0_i32_1 = arith.constant 0 : i32
    return %arg0, %c0_i32, %c0_i32_0 : i32, i32, i32
  }
  func.func @transform_1(%arg0: i32, %arg1: i32) -> (i32, i32, i32) {
    %c0_i32 = arith.constant 0 : i32
    %c0_i32_0 = arith.constant 0 : i32
    %c0_i32_1 = arith.constant 0 : i32
    return %arg0, %c0_i32, %c0_i32_0 : i32, i32, i32
  }
  func.func @transform_2(%arg0: i32, %arg1: i32) -> (i32, i32, i32) {
    %c0_i32 = arith.constant 0 : i32
    %c0_i32_0 = arith.constant 0 : i32
    return %arg0, %arg1, %c0_i32 : i32, i32, i32
  }
  func.func @transform_3(%arg0: i32, %arg1: i32) -> (i32, i32, i32) {
    %c0_i32 = arith.constant 0 : i32
    %c0_i32_0 = arith.constant 0 : i32
    return %arg0, %arg1, %c0_i32 : i32, i32, i32
  }
}

</mosaic_0001>

<bundles_post_ra>
// kernel: tpu_custom_call.1
= control target key start
LH: loop header
LB: loop body
LE: loop exit
PB: predicated region body
PF: predicated region fallthrough
CT: control target
= control target key end

     0   :  { %v186_v1 = vmov 0   ;;  %s267_s0 = inlined_call_operand.vmem [shape: f32[6,1,1], index: 0, kind: input, shape index: {}]   ;;  %s268_s1 = inlined_call_operand.vmem [shape: f32[6,1,1], index: 1, kind: input, shape index: {}]   ;;  %s269_s2 = inlined_call_operand.vmem [shape: f32[6,2,128], index: 2, kind: input, shape index: {}]   ;;  %s270_s3 = inlined_call_operand.hbm [shape: f32[6,2,128], index: 3, kind: output, shape index: {}]  }
   0x1   :  { %v148_v0 = vld [vmem:[%s267_s0 + $0x4] ss:$0 sm:$0xff]  ;;  %147 = vset.pattern.permute.xlu2 %v186_v1  ;;  %146 = vset.pattern.permute.xlu1 %v186_v1  ;;  %v149_v2 = vld [vmem:[%s267_s0 + $0x2] ss:$0 sm:$0xff]  ;;  %v150_v3 = vld [vmem:[%s267_s0] ss:$0 sm:$0xff] }
   0x2   :  { %145 = vset.pattern.permute.xlu0 %v186_v1  ;;  %56 = vperm.xlu2 %147, %v148_v0   ;;  %v151_v4 = vld [vmem:[%s267_s0 + $0x5] ss:$0 sm:$0xff]  ;;  %v152_v5 = vld [vmem:[%s267_s0 + $0x3] ss:$0 sm:$0xff]  ;;  %v153_v6 = vld [vmem:[%s267_s0 + $0x1] ss:$0 sm:$0xff] }
   0x3   :  { %48 = vperm.xlu1 %146, %v149_v2   ;;  %40 = vperm.xlu0 %145, %v150_v3  }
   0x4   :  { %8 = vsyncpa [#allocation3], 0  ;;  %v154_v7 = vld [vmem:[%s268_s1 + $0x2] ss:$0 sm:$0xff]  ;;  %v155_v8 = vld [vmem:[%s268_s1 + $0x1] ss:$0 sm:$0xff] }
   0x5   :  { %v156_v9 = vld [vmem:[%s268_s1] ss:$0 sm:$0xff]  ;;  %v157_v10 = vld [vmem:[%s268_s1 + $0x5] ss:$0 sm:$0xff]  ;;  %v158_v11 = vld [vmem:[%s268_s1 + $0x4] ss:$0 sm:$0xff] }
   0x6   :  { %v159_v12 = vld [vmem:[%s268_s1 + $0x3] ss:$0 sm:$0xff]  ;;  %v20_v16 = vld [vmem:[%s269_s2 + $0xa] sm:$0x3]  ;;  %v17_v18 = vld [vmem:[%s269_s2 + $0x4] sm:$0x3] }
   0x7   :  { %v16_v27 = vld [vmem:[%s269_s2 + $0x2] sm:$0x3]  ;;  %v15_v28 = vld [vmem:[%s269_s2] sm:$0x3]  ;;  %v19_v35 = vld [vmem:[%s269_s2 + $0x8] sm:$0x3] }
   0x8   :  { %v18_v36 = vld [vmem:[%s269_s2 + $0x6] sm:$0x3]  ;;  %s187_s19 = smov [#allocation2]   ;;  %s129_s23 = sshll.u32 %s270_s3, 4  ;;  %s130_s23 = int_to_ptr.hbm [resolvable:$true] %s129_s23 }
   0x9   :  { %s127_s20 = sshll.u32 %s187_s19, 4  ;;  %s188_s24 = smov 32   ;;  %s128_s20 = int_to_ptr.vmem [resolvable:$true] %s127_s20 }
   0xa   :  { %60 = vperm.xlu2 %147, %v151_v4   ;;  %s189_s25 = smov 2  }
   0xb   :  { %52 = vperm.xlu1 %146, %v152_v5   ;;  %44 = vperm.xlu0 %145, %v153_v6  }
  0x12   :  { %96 = vperm.xlu2 %147, %v154_v7  }
  0x13   :  { %92 = vperm.xlu1 %146, %v155_v8   ;;  %88 = vperm.xlu0 %145, %v156_v9  }
  0x1a   :  { %108 = vperm.xlu2 %147, %v157_v10  }
  0x1b   :  { %104 = vperm.xlu1 %146, %v158_v11   ;;  %100 = vperm.xlu0 %145, %v159_v12  }
  0x5c   :  { %v57_v13 = vpop.permute.xlu2 %56 }
  0x5d   :  { %v67_v37 = vmul.f32 %v57_v13, %v19_v35 }
  0x64   :  { %v61_v14 = vpop.permute.xlu2 %60 }
  0x65   :  { %v68_v17 = vmul.f32 %v61_v14, %v20_v16 }
  0x6c   :  { %v97_v15 = vpop.permute.xlu2 %96 }
  0x74   :  { %v109_v19 = vpop.permute.xlu2 %108 }
  0x75   :  { %v116_v20 = vadd.f32 %v109_v19, %v68_v17  ;;  %v49_v21 = vpop.permute.xlu1 %48  ;;  %v41_v23 = vpop.permute.xlu0 %40 }
  0x76   :  { %v65_v22 = vmul.f32 %v49_v21, %v17_v18  ;;  %v63_v30 = vmul.f32 %v41_v23, %v15_v28 }
  0x77   :  { %122 = vst [vmem:[#allocation2 + $0xa] sm:$0x3] %v116_v20 }
  0x78   :  { %v113_v24 = vadd.f32 %v97_v15, %v65_v22 }
  0x7a   :  { %119 = vst [vmem:[#allocation2 + $0x4] sm:$0x3] %v113_v24 }
  0x7d   :  { %v53_v25 = vpop.permute.xlu1 %52  ;;  %v45_v26 = vpop.permute.xlu0 %44 }
  0x7e   :  { %v64_v29 = vmul.f32 %v45_v26, %v16_v27  ;;  %v66_v38 = vmul.f32 %v53_v25, %v18_v36 }
  0x85   :  { %v93_v31 = vpop.permute.xlu1 %92  ;;  %v89_v33 = vpop.permute.xlu0 %88 }
  0x86   :  { %v112_v32 = vadd.f32 %v93_v31, %v64_v29  ;;  %v111_v34 = vadd.f32 %v89_v33, %v63_v30 }
  0x88   :  { %118 = vst [vmem:[#allocation2 + $0x2] sm:$0x3] %v112_v32 }
  0x89   :  { %117 = vst [vmem:[#allocation2] sm:$0x3] %v111_v34 }
  0x8d   :  { %v105_v39 = vpop.permute.xlu1 %104  ;;  %v101_v41 = vpop.permute.xlu0 %100 }
  0x8e   :  { %v115_v40 = vadd.f32 %v105_v39, %v67_v37  ;;  %v114_v42 = vadd.f32 %v101_v41, %v66_v38 }
  0x90   :  { %121 = vst [vmem:[#allocation2 + $0x8] sm:$0x3] %v115_v40 }
  0x91   :  { %120 = vst [vmem:[#allocation2 + $0x6] sm:$0x3] %v114_v42 }
  0x92   :  { %135 = dma.vmem_to_hbm [thread:$0]  %s128_s20, 192, %s130_s23, [#allocation3], %s188_s24, %s188_s24, %s189_s25  }
  0x93   :  { %184 = dma.done.wait [#allocation3], 192  }
  0x94   :  { %185 = vsyncadd [#allocation3], 4294967104 }
  0x95   :  { %140 = vsyncpa [#allocation3], 1 }

</bundles_post_ra>
